<compile_context>
chip_gen: v7x
topology: tpu7x:2x2x1
jax: 0.10.0
libtpu: 0.0.40
codegen_flags: <defaults>
</compile_context>

<pallas_src>
import jax
import jax.numpy as jnp
from jax import lax
from jax.experimental import pallas as pl
from jax.experimental.pallas import tpu as pltpu


# --------------------------------------------------------------------------
# Geometry / budget helpers
# --------------------------------------------------------------------------
def _round_up(x, m):
    return (x + m - 1) // m * m


def _vmem_budget():
    """(vmem_limit_bytes, big_vmem) chosen from the actual chip generation."""
    try:
        cap = int(pltpu.get_tpu_info().vmem_capacity_bytes)
    except Exception:
        cap = 0
    if cap <= 0:
        cap = 64 * 1024 * 1024                     # conservative: v7x-sized VMEM
    limit = max(32 * 1024 * 1024,
                min(cap - 16 * 1024 * 1024, 96 * 1024 * 1024))
    return limit, cap >= 100 * 1024 * 1024


def _pick_geometry(n, big_vmem):
    """Padded node count Npad and (row, col) block sizes for the adj stream.

    Row tiles: 512 on 128-MiB-VMEM parts (v5e/v6e), 256 on v7x.  The contraction
    dim is tiled at 2048 so VMEM stays O(tm*tk) for any N.  Small problems
    collapse to a single block (no per-step pipeline overhead).
    """
    tm_max = 512 if big_vmem else 256
    tk_max = 2048
    if n >= tk_max:
        return _round_up(n, tk_max), tm_max, tk_max
    npad = max(256, _round_up(n, 256))
    tm = tm_max
    while npad % tm:
        tm //= 2
    return npad, tm, npad


# --------------------------------------------------------------------------
# Kernel A: single pass over adj -> H1 = relu((adj@X)W1 + b1)  and  padj = pool@adj
# --------------------------------------------------------------------------
def _fused_adj_kernel(adj_ref, x_ref, poolT_ref, w1_ref, b1_ref,
                      h1_ref, padj_ref, ax_acc):
    i = pl.program_id(0)
    k = pl.program_id(1)
    tk = adj_ref.shape[1]

    @pl.when((i == 0) & (k == 0))
    def _():
        padj_ref[...] = jnp.zeros_like(padj_ref)

    @pl.when(k == 0)
    def _():
        ax_acc[...] = jnp.zeros_like(ax_acc)

    adj_blk = adj_ref[...]                                    # (tm, tk) bf16

    # conv1 partial: (adj @ X) over this K block; bf16 x bf16 -> f32 on the MXU.
    ax_acc[...] += jnp.dot(adj_blk, x_ref[...],
                           preferred_element_type=jnp.float32)

    # pool @ adj partial: padj[:, k-block] += poolT_block^T @ adj_block.
    part = lax.dot_general(poolT_ref[...], adj_blk,
                           dimension_numbers=(((0,), (0,)), ((), ())),
                           preferred_element_type=jnp.float32)
    col = pl.multiple_of(k * tk, 128)
    padj_ref[:, pl.ds(col, tk)] += part

    @pl.when(k == pl.num_programs(1) - 1)
    def _():
        # conv1 epilogue for this row block: (adj @ X) @ W1 + b1, ReLU.
        h = jnp.dot(ax_acc[...].astype(jnp.bfloat16), w1_ref[...],
                    preferred_element_type=jnp.float32) + b1_ref[...]
        h1_ref[...] = jnp.maximum(h, 0.0).astype(h1_ref.dtype)


# --------------------------------------------------------------------------
# Kernel B: pooled = padj @ H1, then conv2 weight/bias + Linear  -> [G, C]
# --------------------------------------------------------------------------
def _pool_epilogue_kernel(padj_ref, h1_ref, w2_ref, b2_ref, wl_ref, bl_ref,
                          out_ref, pooled_acc):
    j = pl.program_id(0)

    @pl.when(j == 0)
    def _():
        pooled_acc[...] = jnp.zeros_like(pooled_acc)

    pooled_acc[...] += jnp.dot(padj_ref[...].astype(jnp.bfloat16), h1_ref[...],
                               preferred_element_type=jnp.float32)

    @pl.when(j == pl.num_programs(0) - 1)
    def _():
        # conv2 weight + bias (b2 passes through the mean pool: rows sum to 1).
        h2 = jnp.dot(pooled_acc[...].astype(jnp.bfloat16), w2_ref[...],
                     preferred_element_type=jnp.float32) + b2_ref[...]
        # dropout(p=0.5): identity in eval mode (inference semantics).
        # TODO(synk): training-mode dropout needs pltpu.prng_random_bits masking.
        out_ref[...] = (jnp.dot(h2.astype(jnp.bfloat16), wl_ref[...],
                                preferred_element_type=jnp.float32)
                        + bl_ref[...])


# --------------------------------------------------------------------------
# Wrapper
# --------------------------------------------------------------------------
def gcn_forward(adj, x, w1, b1, w2, b2, pool, wl, bl):
    N = adj.shape[0]
    F = x.shape[1]
    H = w1.shape[1]
    G = pool.shape[0]
    C = wl.shape[1]

    vmem_limit, big_vmem = _vmem_budget()
    Np, tm, tk = _pick_geometry(N, big_vmem)
    nb_i, nb_k = Np // tm, Np // tk

    # bf16 streaming operands (halves the dominant N^2 DMA); zero-pad to Np so
    # the grid is tile-legal for any N.  Padded adj rows/cols and pool columns
    # are zero, so padded nodes contribute nothing to any output.
    adj_p = jnp.zeros((Np, Np), jnp.bfloat16).at[:N, :N].set(adj.astype(jnp.bfloat16))
    x_p = jnp.zeros((Np, F), jnp.bfloat16).at[:N, :].set(x.astype(jnp.bfloat16))
    poolT_p = jnp.zeros((Np, G), jnp.bfloat16).at[:N, :].set(pool.T.astype(jnp.bfloat16))
    w1_bf = w1.astype(jnp.bfloat16)
    w2_bf = w2.astype(jnp.bfloat16)
    wl_bf = wl.astype(jnp.bfloat16)

    # Both grid axes are reduction axes for one of the two accumulators
    # (padj over i, conv1's ax over k) -> "arbitrary".  The pass is HBM-bound
    # on the adj stream, so v7x megacore would not help here anyway.
    cp_a = pltpu.CompilerParams(
        dimension_semantics=("arbitrary", "arbitrary"),
        vmem_limit_bytes=vmem_limit)
    cp_b = pltpu.CompilerParams(
        dimension_semantics=("arbitrary",),
        vmem_limit_bytes=vmem_limit)

    # ---- Kernel A: one pass over adj -> H1 [Np, H] (bf16), padj [G, Np] (f32)
    h1, padj = pl.pallas_call(
        _fused_adj_kernel,
        out_shape=(jax.ShapeDtypeStruct((Np, H), jnp.bfloat16),
                   jax.ShapeDtypeStruct((G, Np), jnp.float32)),
        grid=(nb_i, nb_k),
        in_specs=[
            pl.BlockSpec((tm, tk), lambda i, k: (i, k)),    # adj block (streamed)
            pl.BlockSpec((tk, F), lambda i, k: (k, 0)),     # X rows for this K block
            pl.BlockSpec((tm, G), lambda i, k: (i, 0)),     # pool^T row block
            pl.BlockSpec((F, H), lambda i, k: (0, 0)),      # W1
            pl.BlockSpec((1, H), lambda i, k: (0, 0)),      # b1
        ],
        out_specs=(
            pl.BlockSpec((tm, H), lambda i, k: (i, 0)),     # H1 row block
            pl.BlockSpec((G, Np), lambda i, k: (0, 0)),     # padj (resident accumulator)
        ),
        scratch_shapes=[pltpu.VMEM((tm, F), jnp.float32)],
        compiler_params=cp_a,
    )(adj_p, x_p, poolT_p, w1_bf, b1)

    # ---- Kernel B: pooled = padj @ H1, then W2/b2 and Wl/bl epilogue -> [G, C]
    tn = min(2048, Np)           # Np is a multiple of tn by construction
    out = pl.pallas_call(
        _pool_epilogue_kernel,
        out_shape=jax.ShapeDtypeStruct((G, C), jnp.float32),
        grid=(Np // tn,),
        in_specs=[
            pl.BlockSpec((G, tn), lambda j: (0, j)),        # padj column block
            pl.BlockSpec((tn, H), lambda j: (j, 0)),        # H1 row block
            pl.BlockSpec((H, H), lambda j: (0, 0)),         # W2
            pl.BlockSpec((1, H), lambda j: (0, 0)),         # b2
            pl.BlockSpec((H, C), lambda j: (0, 0)),         # Wl
            pl.BlockSpec((1, C), lambda j: (0, 0)),         # bl
        ],
        out_specs=pl.BlockSpec((G, C), lambda j: (0, 0)),
        scratch_shapes=[pltpu.VMEM((G, H), jnp.float32)],
        compiler_params=cp_b,
    )(padj, h1, w2_bf, b2, wl_bf, bl)
    return out


# --------------------------------------------------------------------------
# Glue: normalized adjacency + pooling matrix from edge_index / batch
# --------------------------------------------------------------------------
def normalized_adjacency(edge_index, num_nodes):
    """D^-1/2 (A + I) D^-1/2 as a dense [N, N] matrix (GCNConv propagation)."""
    src, dst = edge_index
    A = jnp.zeros((num_nodes, num_nodes), jnp.float32)
    A = A.at[dst, src].set(1.0)                       # messages flow src -> dst
    A = A + jnp.eye(num_nodes, dtype=jnp.float32)     # add self loops
    deg = A.sum(axis=1)
    d_inv_sqrt = jnp.where(deg > 0, 1.0 / jnp.sqrt(deg), 0.0)
    return d_inv_sqrt[:, None] * A * d_inv_sqrt[None, :]


def mean_pool_matrix(batch, num_graphs):
    """Row-normalized one-hot assignment [G, N] so pool @ H = per-graph mean."""
    onehot = (batch[None, :] == jnp.arange(num_graphs)[:, None]).astype(jnp.float32)
    counts = onehot.sum(axis=1, keepdims=True)
    return onehot / jnp.maximum(counts, 1.0)


# --------------------------------------------------------------------------
# Main
# --------------------------------------------------------------------------
if __name__ == "__main__":
    # small, deterministic problem sizes
    N = 16            # total nodes across all graphs
    F = 4             # dataset.num_node_features
    H = 32            # hidden_channels
    C = 4             # dataset.num_classes
    G = 2             # number of graphs in the batch

    key = jax.random.PRNGKey(0)
    k = jax.random.split(key, 8)

    # node features
    x = jax.random.normal(k[0], (N, F), jnp.float32)

    # random undirected edges (made symmetric), within-graph only
    src = jax.random.randint(k[1], (24,), 0, N // 2)
    dst = jax.random.randint(k[2], (24,), 0, N // 2)
    src2 = jax.random.randint(k[3], (24,), N // 2, N)
    dst2 = jax.random.randint(k[4], (24,), N // 2, N)
    ei_src = jnp.concatenate([src, dst, src2, dst2])
    ei_dst = jnp.concatenate([dst, src, dst2, src2])
    edge_index = jnp.stack([ei_src, ei_dst])

    # batch vector: first half of nodes -> graph 0, second half -> graph 1
    batch = jnp.concatenate([jnp.zeros(N // 2, jnp.int32),
                             jnp.ones(N // 2, jnp.int32)])

    # deterministic parameter init (synthetic; Glorot-ish scaling)
    def glorot(rng, shape):
        fan_in, fan_out = shape
        lim = jnp.sqrt(6.0 / (fan_in + fan_out))
        return jax.random.uniform(rng, shape, jnp.float32, -lim, lim)

    w1 = glorot(k[5], (F, H)); b1 = jnp.zeros((1, H), jnp.float32)
    w2 = glorot(k[6], (H, H)); b2 = jnp.zeros((1, H), jnp.float32)
    wl = glorot(k[7], (H, C)); bl = jnp.zeros((1, C), jnp.float32)

    adj = normalized_adjacency(edge_index, N)
    pool = mean_pool_matrix(batch, G)

    out = gcn_forward(adj, x, w1, b1, w2, b2, pool, wl, bl)
    jax.block_until_ready(out)

    # pure-JAX reference check (same bf16-rounded operands; f32 math)
    adj_r = adj.astype(jnp.bfloat16).astype(jnp.float32)
    x_r = x.astype(jnp.bfloat16).astype(jnp.float32)
    w1_r = w1.astype(jnp.bfloat16).astype(jnp.float32)
    w2_r = w2.astype(jnp.bfloat16).astype(jnp.float32)
    wl_r = wl.astype(jnp.bfloat16).astype(jnp.float32)
    pool_r = pool.astype(jnp.bfloat16).astype(jnp.float32)

    h_ref = jnp.maximum(adj_r @ (x_r @ w1_r) + b1, 0.0)
    h2_ref = adj_r @ (h_ref @ w2_r) + b2
    ref = (pool_r @ h2_ref) @ wl_r + bl
    assert jnp.allclose(out, ref, atol=5e-2, rtol=5e-2), "mismatch vs reference"

    print("KERNEL_OK")
</pallas_src>

<mosaic_0001>
module attributes {stable_mosaic.version = 11 : i64} {
  func.func @_fused_adj_kernel(%arg0: i32, %arg1: i32, %arg2: memref<256x256xbf16, #tpu.memory_space<vmem>>, %arg3: memref<256x4xbf16, #tpu.memory_space<vmem>>, %arg4: memref<256x2xbf16, #tpu.memory_space<vmem>>, %arg5: memref<4x32xbf16, #tpu.memory_space<vmem>>, %arg6: memref<1x32xf32, #tpu.memory_space<vmem>>, %arg7: memref<256x32xbf16, #tpu.memory_space<vmem>>, %arg8: memref<2x256xf32, #tpu.memory_space<vmem>>, %arg9: memref<256x4xf32, #tpu.memory_space<vmem>>) attributes {dimension_semantics = [#tpu.dimension_semantics<arbitrary>, #tpu.dimension_semantics<arbitrary>], iteration_bounds = array<i64: 1, 1>, scalar_prefetch = 0 : i64, scratch_operands = 1 : i64, tpu.core_type = #tpu.core_type<tc>, window_params = [{transform_indices = @transform_0, window_bounds = array<i64: 256, 256>}, {transform_indices = @transform_1, window_bounds = array<i64: 256, 4>}, {transform_indices = @transform_2, window_bounds = array<i64: 256, 2>}, {pipeline_mode = #tpu.pipeline_mode<synchronous>, transform_indices = @transform_3, window_bounds = array<i64: 4, 32>}, {pipeline_mode = #tpu.pipeline_mode<synchronous>, transform_indices = @transform_4, window_bounds = array<i64: 1, 32>}, {transform_indices = @transform_5, window_bounds = array<i64: 256, 32>}, {pipeline_mode = #tpu.pipeline_mode<synchronous>, transform_indices = @transform_6, window_bounds = array<i64: 2, 256>}]} {
    %c0_i32 = arith.constant 0 : i32
    %0 = arith.cmpi eq, %arg0, %c0_i32 : i32
    %c0_i32_0 = arith.constant 0 : i32
    %1 = arith.cmpi eq, %arg1, %c0_i32_0 : i32
    %2 = arith.andi %0, %1 : i1
    %3 = arith.extui %2 : i1 to i32
    %c0_i32_1 = arith.constant 0 : i32
    %4 = arith.cmpi ne, %3, %c0_i32_1 : i32
    scf.if %4 {
      %cst_18 = arith.constant 0.000000e+00 : f32
      %26 = vector.broadcast %cst_18 : f32 to vector<2x256xf32>
      %c0_19 = arith.constant 0 : index
      %c0_20 = arith.constant 0 : index
      %27 = vector.load %arg8[%c0_19, %c0_20] : memref<2x256xf32, #tpu.memory_space<vmem>>, vector<2x256xf32>
      tpu.vector_store %arg8[%c0_19, %c0_20], %26 {strides = array<i32>} : memref<2x256xf32, #tpu.memory_space<vmem>>, vector<2x256xf32>,
    } else {
    }
    %c0_i32_2 = arith.constant 0 : i32
    %5 = arith.cmpi eq, %arg1, %c0_i32_2 : i32
    %6 = arith.extui %5 : i1 to i32
    %c0_i32_3 = arith.constant 0 : i32
    %7 = arith.cmpi ne, %6, %c0_i32_3 : i32
    scf.if %7 {
      %cst_18 = arith.constant 0.000000e+00 : f32
      %26 = vector.broadcast %cst_18 : f32 to vector<256x4xf32>
      %c0_19 = arith.constant 0 : index
      %c0_20 = arith.constant 0 : index
      %27 = vector.load %arg9[%c0_19, %c0_20] : memref<256x4xf32, #tpu.memory_space<vmem>>, vector<256x4xf32>
      tpu.vector_store %arg9[%c0_19, %c0_20], %26 {strides = array<i32>} : memref<256x4xf32, #tpu.memory_space<vmem>>, vector<256x4xf32>,
    } else {
    }
    %c0 = arith.constant 0 : index
    %c0_4 = arith.constant 0 : index
    %8 = vector.load %arg2[%c0, %c0_4] : memref<256x256xbf16, #tpu.memory_space<vmem>>, vector<256x256xbf16>
    %c0_5 = arith.constant 0 : index
    %c0_6 = arith.constant 0 : index
    %9 = vector.load %arg9[%c0_5, %c0_6] : memref<256x4xf32, #tpu.memory_space<vmem>>, vector<256x4xf32>
    %c0_7 = arith.constant 0 : index
    %c0_8 = arith.constant 0 : index
    %10 = vector.load %arg3[%c0_7, %c0_8] : memref<256x4xbf16, #tpu.memory_space<vmem>>, vector<256x4xbf16>
    %cst = arith.constant dense<0.000000e+00> : vector<256x4xf32>
    %11 = tpu.matmul %8, %10, %cst {dimension_numbers = #tpu.dot_dimension_numbers<[1], [0], [0], [1], [0, 0, 1, 1], [], []>} : vector<256x256xbf16>, vector<256x4xbf16>, vector<256x4xf32> -> vector<256x4xf32>
    %12 = arith.addf %9, %11 : vector<256x4xf32>
    %c0_9 = arith.constant 0 : index
    %c0_10 = arith.constant 0 : index
    %13 = vector.load %arg9[%c0_9, %c0_10] : memref<256x4xf32, #tpu.memory_space<vmem>>, vector<256x4xf32>
    tpu.vector_store %arg9[%c0_9, %c0_10], %12 {strides = array<i32>} : memref<256x4xf32, #tpu.memory_space<vmem>>, vector<256x4xf32>,
    %c0_11 = arith.constant 0 : index
    %c0_12 = arith.constant 0 : index
    %14 = vector.load %arg4[%c0_11, %c0_12] : memref<256x2xbf16, #tpu.memory_space<vmem>>, vector<256x2xbf16>
    %cst_13 = arith.constant dense<0.000000e+00> : vector<2x256xf32>
    %15 = tpu.matmul %14, %8, %cst_13 {dimension_numbers = #tpu.dot_dimension_numbers<[0], [0], [1], [1], [0, 1, 1, 1], [], []>} : vector<256x2xbf16>, vector<256x256xbf16>, vector<2x256xf32> -> vector<2x256xf32>
    %c256_i32 = arith.constant 256 : i32
    %16 = arith.muli %arg1, %c256_i32 : i32
    %17 = tpu.assume_multiple %16, 128 : i32
    %c0_14 = arith.constant 0 : index
    %18 = arith.index_cast %17 : i32 to index
    %19 = vector.load %arg8[%c0_14, %18] : memref<2x256xf32, #tpu.memory_space<vmem>>, vector<2x256xf32>
    %20 = arith.addf %19, %15 : vector<2x256xf32>
    %c0_15 = arith.constant 0 : index
    %21 = arith.index_cast %17 : i32 to index
    %22 = vector.load %arg8[%c0_15, %21] : memref<2x256xf32, #tpu.memory_space<vmem>>, vector<2x256xf32>
    tpu.vector_store %arg8[%c0_15, %21], %20 {strides = array<i32>} : memref<2x256xf32, #tpu.memory_space<vmem>>, vector<2x256xf32>,
    %c0_i32_16 = arith.constant 0 : i32
    %23 = arith.cmpi eq, %arg1, %c0_i32_16 : i32
    %24 = arith.extui %23 : i1 to i32
    %c0_i32_17 = arith.constant 0 : i32
    %25 = arith.cmpi ne, %24, %c0_i32_17 : i32
    scf.if %25 {
      %c0_18 = arith.constant 0 : index
      %c0_19 = arith.constant 0 : index
      %26 = vector.load %arg9[%c0_18, %c0_19] : memref<256x4xf32, #tpu.memory_space<vmem>>, vector<256x4xf32>
      %27 = arith.truncf %26 : vector<256x4xf32> to vector<256x4xbf16>
      %c0_20 = arith.constant 0 : index
      %c0_21 = arith.constant 0 : index
      %28 = vector.load %arg5[%c0_20, %c0_21] : memref<4x32xbf16, #tpu.memory_space<vmem>>, vector<4x32xbf16>
      %cst_22 = arith.constant dense<0.000000e+00> : vector<256x32xf32>
      %29 = tpu.matmul %27, %28, %cst_22 {dimension_numbers = #tpu.dot_dimension_numbers<[1], [0], [0], [1], [0, 0, 1, 1], [], []>} : vector<256x4xbf16>, vector<4x32xbf16>, vector<256x32xf32> -> vector<256x32xf32>
      %c0_23 = arith.constant 0 : index
      %c0_24 = arith.constant 0 : index
      %30 = vector.load %arg6[%c0_23, %c0_24] : memref<1x32xf32, #tpu.memory_space<vmem>>, vector<1x32xf32>
      %31 = vector.broadcast %30 : vector<1x32xf32> to vector<256x32xf32>
      %32 = arith.addf %29, %31 : vector<256x32xf32>
      %cst_25 = arith.constant 0.000000e+00 : f32
      %33 = vector.broadcast %cst_25 : f32 to vector<256x32xf32>
      %34 = arith.maximumf %32, %33 : vector<256x32xf32>
      %35 = arith.truncf %34 : vector<256x32xf32> to vector<256x32xbf16>
      %c0_26 = arith.constant 0 : index
      %c0_27 = arith.constant 0 : index
      %36 = vector.load %arg7[%c0_26, %c0_27] : memref<256x32xbf16, #tpu.memory_space<vmem>>, vector<256x32xbf16>
      tpu.vector_store %arg7[%c0_26, %c0_27], %35 {strides = array<i32>} : memref<256x32xbf16, #tpu.memory_space<vmem>>, vector<256x32xbf16>,
    } else {
    }
    return
  }
  func.func @transform_0(%arg0: i32, %arg1: i32) -> (i32, i32) {
    %c0_i32 = arith.constant 0 : i32
    return %arg0, %arg1 : i32, i32
  }
  func.func @transform_1(%arg0: i32, %arg1: i32) -> (i32, i32) {
    %c0_i32 = arith.constant 0 : i32
    %c0_i32_0 = arith.constant 0 : i32
    return %arg1, %c0_i32 : i32, i32
  }
  func.func @transform_2(%arg0: i32, %arg1: i32) -> (i32, i32) {
    %c0_i32 = arith.constant 0 : i32
    %c0_i32_0 = arith.constant 0 : i32
    return %arg0, %c0_i32 : i32, i32
  }
  func.func @transform_3(%arg0: i32, %arg1: i32) -> (i32, i32) {
    %c0_i32 = arith.constant 0 : i32
    %c0_i32_0 = arith.constant 0 : i32
    %c0_i32_1 = arith.constant 0 : i32
    return %c0_i32, %c0_i32_0 : i32, i32
  }
  func.func @transform_4(%arg0: i32, %arg1: i32) -> (i32, i32) {
    %c0_i32 = arith.constant 0 : i32
    %c0_i32_0 = arith.constant 0 : i32
    %c0_i32_1 = arith.constant 0 : i32
    return %c0_i32, %c0_i32_0 : i32, i32
  }
  func.func @transform_5(%arg0: i32, %arg1: i32) -> (i32, i32) {
    %c0_i32 = arith.constant 0 : i32
    %c0_i32_0 = arith.constant 0 : i32
    return %arg0, %c0_i32 : i32, i32
  }
  func.func @transform_6(%arg0: i32, %arg1: i32) -> (i32, i32) {
    %c0_i32 = arith.constant 0 : i32
    %c0_i32_0 = arith.constant 0 : i32
    %c0_i32_1 = arith.constant 0 : i32
    return %c0_i32, %c0_i32_0 : i32, i32
  }
}

</mosaic_0001>

<bundles_post_ra>
// kernel: tpu_custom_call.1
= control target key start
LH: loop header
LB: loop body
LE: loop exit
PB: predicated region body
PF: predicated region fallthrough
CT: control target
= control target key end

     0   :  { %s2324_s0 = inlined_call_operand.vmem [shape: bf16[256,256], index: 0, kind: input, shape index: {}]   ;;  %s2325_s1 = inlined_call_operand.vmem [shape: bf16[256,4], index: 1, kind: input, shape index: {}]   ;;  %s2326_s2 = inlined_call_operand.vmem [shape: bf16[256,2], index: 2, kind: input, shape index: {}]   ;;  %s2327_s3 = inlined_call_operand.vmem [shape: bf16[4,32], index: 3, kind: input, shape index: {}]   ;;  %s2328_s4 = inlined_call_operand.vmem [shape: f32[1,32], index: 4, kind: input, shape index: {}]   ;;  %s2329_s5 = inlined_call_operand.vmem [shape: bf16[256,32], index: 5, kind: output, shape index: {0}]   ;;  %s2330_s6 = inlined_call_operand.hbm [shape: f32[2,256], index: 6, kind: output, shape index: {1}]  }
   0x1   :  { %v1662_v0 = vld [vmem:[%s2325_s1 + $0x40] sm:$0xff]   ;;  %v1664_v2 = vld [vmem:[%s2325_s1 + $0x48] sm:$0xff]   ;;  %v1666_v4 = vld [vmem:[%s2325_s1 + $0x50] sm:$0xff]  }
   0x2   :  { %v1663_v1 = vld [vmem:[%s2325_s1] sm:$0xff]   ;;  %1495 = vmatprep.subr.bf16.mxu0 %v1662_v0  ;;  %v1665_v3 = vld [vmem:[%s2325_s1 + $0x8] sm:$0xff]   ;;  %v1667_v5 = vld [vmem:[%s2325_s1 + $0x10] sm:$0xff]  }
   0x3   :  { %1496 = vmatpush3.bf16.msra.mxu0 %v1663_v1  ;;  %v1668_v6 = vld [vmem:[%s2325_s1 + $0x58] sm:$0xff]   ;;  %v1670_v8 = vld [vmem:[%s2325_s1 + $0x60] sm:$0xff]   ;;  %v1672_v10 = vld [vmem:[%s2325_s1 + $0x68] sm:$0xff]  }
   0x4   :  { %1497 = vmatprep.subr.bf16.mxu0 %v1664_v2  ;;  %v1669_v7 = vld [vmem:[%s2325_s1 + $0x18] sm:$0xff]   ;;  %v1671_v9 = vld [vmem:[%s2325_s1 + $0x20] sm:$0xff]   ;;  %v1673_v12 = vld [vmem:[%s2325_s1 + $0x28] sm:$0xff]  }
   0x5   :  { %v1680_v11 = vld [vmem:[%s2324_s0 + $0x4] ss:$8 sps:$4 sm:$0xff]   ;;  %v1674_v13 = vld [vmem:[%s2325_s1 + $0x70] sm:$0xff]   ;;  %v1678_v14 = vld [vmem:[%s2324_s0] ss:$8 sps:$4 sm:$0xff]  }
   0x6   :  { %451 = vmatprep.mubr.bf16.mxu0 %v1680_v11  ;;  %v1681_v15 = vld [vmem:[%s2324_s0 + $0x14] ss:$8 sps:$4 sm:$0xff]   ;;  %805 = vmatprep.subr.bf16.mxu1 %v1680_v11  ;;  %v1683_v18 = vld [vmem:[%s2324_s0 + $0x10] ss:$8 sps:$4 sm:$0xff]   ;;  %v1684_v19 = vld [vmem:[%s2324_s0 + $0x24] ss:$8 sps:$4 sm:$0xff]  }
   0x7   :  { %1498 = vmatpush3.bf16.msra.mxu0 %v1665_v3  ;;  %806 = vmatpush1.bf16.msra.mxu1 %v1678_v14  ;;  %v1675_v16 = vld [vmem:[%s2325_s1 + $0x30] sm:$0xff]   ;;  %v1676_v17 = vld [vmem:[%s2325_s1 + $0x78] sm:$0xff]   ;;  %v1686_v21 = vld [vmem:[%s2324_s0 + $0x20] ss:$8 sps:$4 sm:$0xff]  }
   0x8   :  { %1499 = vmatprep.subr.bf16.mxu0 %v1666_v4  ;;  %807 = vmatprep.subr.bf16.mxu1 %v1681_v15  ;;  %v1677_v20 = vld [vmem:[%s2325_s1 + $0x38] sm:$0xff]   ;;  %v1690_v24 = vld [vmem:[%s2324_s0 + $0x44] ss:$8 sps:$4 sm:$0xff]   ;;  %v1882_v25 = vld [vmem:[%s2324_s0 + $0x40] ss:$8 sps:$4 sm:$0xff]  }
   0x9   :  { %v1687_v22 = vld [vmem:[%s2324_s0 + $0x34] ss:$8 sps:$4 sm:$0xff]   ;;  %v1689_v23 = vld [vmem:[%s2324_s0 + $0x30] ss:$8 sps:$4 sm:$0xff]   ;;  %v1898_v28 = vld [vmem:[%s2324_s0 + $0x64] ss:$8 sps:$4 sm:$0xff]  }
   0xa   :  { %v1887_v26 = vld [vmem:[%s2324_s0 + $0x54] ss:$8 sps:$4 sm:$0xff]   ;;  %v1892_v27 = vld [vmem:[%s2324_s0 + $0x50] ss:$8 sps:$4 sm:$0xff]   ;;  %v1726_v29 = vld [vmem:[%s2326_s2 + $0x40] sm:$0xff]  }
   0xb   :  { %1500 = vmatpush3.bf16.msra.mxu0 %v1667_v5  ;;  %808 = vmatpush1.bf16.msra.mxu1 %v1683_v18  ;;  %v1727_v30 = vld [vmem:[%s2326_s2] sm:$0xff]   ;;  %v1728_v31 = vld [vmem:[%s2326_s2 + $0x48] sm:$0xff]   ;;  %v1923_v34 = vld [vmem:[%s2324_s0 + $0x74] ss:$8 sps:$4 sm:$0xff]  }
   0xc   :  { %1501 = vmatprep.subr.bf16.mxu0 %v1668_v6  ;;  %809 = vmatprep.subr.bf16.mxu1 %v1684_v19  ;;  %v1729_v32 = vld [vmem:[%s2326_s2 + $0x8] sm:$0xff]   ;;  %v1730_v35 = vld [vmem:[%s2326_s2 + $0x50] sm:$0xff]   ;;  %v1732_v39 = vld [vmem:[%s2326_s2 + $0x58] sm:$0xff]  }
   0xd   :  { %789 = vxpose.xlu0.c.b16.start [1/8] (narrow) %v1726_v29, 16  ;;  %773 = vxpose.xlu1.c.b16.start [1/8] (narrow) %v1727_v30, 16  ;;  %v1917_v33 = vld [vmem:[%s2324_s0 + $0x60] ss:$8 sps:$4 sm:$0xff]   ;;  %v1731_v36 = vld [vmem:[%s2326_s2 + $0x10] sm:$0xff]   ;;  %v1733_v40 = vld [vmem:[%s2326_s2 + $0x18] sm:$0xff]  }
   0xe   :  { %v1935_v37 = vld [vmem:[%s2324_s0 + $0x70] ss:$8 sps:$4 sm:$0xff]   ;;  %v1941_v38 = vld [vmem:[%s2324_s0 + $0x84] ss:$8 sps:$4 sm:$0xff]   ;;  %v1704_v41 = vld [vmem:[%s2324_s0 + $0x80] ss:$8 sps:$4 sm:$0xff]  }
   0xf   :  { %1502 = vmatpush3.bf16.msra.mxu0 %v1669_v7  ;;  %810 = vmatpush1.bf16.msra.mxu1 %v1686_v21  ;;  %v1705_v42 = vld [vmem:[%s2324_s0 + $0x94] ss:$8 sps:$4 sm:$0xff]   ;;  %v1734_v43 = vld [vmem:[%s2326_s2 + $0x60] sm:$0xff]  }
  0x10   :  { %1503 = vmatprep.subr.bf16.mxu0 %v1670_v8  ;;  %811 = vmatprep.subr.bf16.mxu1 %v1687_v22  ;;  %v1735_v44 = vld [vmem:[%s2326_s2 + $0x20] sm:$0xff]  }
  0x11   :  { %790 = vxpose.xlu0.c.b16.cont [2/8] (narrow) %v1728_v31, 16  ;;  %774 = vxpose.xlu1.c.b16.cont [2/8] (narrow) %v1729_v32, 16 }
  0x13   :  { %1504 = vmatpush3.bf16.msra.mxu0 %v1671_v9  ;;  %812 = vmatpush1.bf16.msra.mxu1 %v1689_v23 }
  0x14   :  { %1505 = vmatprep.subr.bf16.mxu0 %v1672_v10  ;;  %813 = vmatprep.subr.bf16.mxu1 %v1690_v24 }
  0x15   :  { %791 = vxpose.xlu0.c.b16.cont [3/8] (narrow) %v1730_v35, 16  ;;  %775 = vxpose.xlu1.c.b16.cont [3/8] (narrow) %v1731_v36, 16 }
  0x17   :  { %1506 = vmatpush3.bf16.msra.mxu0 %v1673_v12  ;;  %814 = vmatpush1.bf16.msra.mxu1 %v1882_v25 }
  0x18   :  { %1507 = vmatprep.subr.bf16.mxu0 %v1674_v13  ;;  %815 = vmatprep.subr.bf16.mxu1 %v1887_v26 }
  0x19   :  { %792 = vxpose.xlu0.c.b16.cont [4/8] (narrow) %v1732_v39, 16  ;;  %776 = vxpose.xlu1.c.b16.cont [4/8] (narrow) %v1733_v40, 16 }
  0x1b   :  { %1508 = vmatpush3.bf16.msra.mxu0 %v1675_v16  ;;  %816 = vmatpush1.bf16.msra.mxu1 %v1892_v27 }
  0x1c   :  { %1509 = vmatprep.subr.bf16.mxu0 %v1676_v17  ;;  %817 = vmatprep.subr.bf16.mxu1 %v1898_v28 }
  0x1f   :  { %1510 = vmatpush3.bf16.msra.mxu0 %v1677_v20  ;;  %818 = vmatpush1.bf16.msra.mxu1 %v1917_v33 }
  0x20   :  { %819 = vmatprep.subr.bf16.mxu1 %v1923_v34 }
  0x22   :  { %452 = vmatmul.mubr.bf16.vlgmr.msra.gmra.mrb[0].mxu0 %v1678_v14 }
  0x23   :  { %459 = vmatprep.mubr.bf16.mxu0 %v1681_v15  ;;  %820 = vmatpush1.bf16.msra.mxu1 %v1935_v37 }
  0x24   :  { %821 = vmatprep.subr.bf16.mxu1 %v1941_v38 }
  0x27   :  { %822 = vmatpush1.bf16.msra.mxu1 %v1704_v41 }
  0x2a   :  { %460 = vmatmul.mubr.bf16.gmra.mrb[4].mxu0 %v1683_v18 }
  0x2b   :  { %467 = vmatprep.mubr.bf16.mxu0 %v1684_v19 }
  0x32   :  { %468 = vmatmul.mubr.bf16.gmra.mrb[8].mxu0 %v1686_v21 }
  0x33   :  { %475 = vmatprep.mubr.bf16.mxu0 %v1687_v22 }
  0x34   :  { %12 = vsyncpa [#allocation4], 0  ;;  %823 = vmatprep.subr.bf16.mxu1 %v1705_v42  ;;  %v1707_v45 = vld [vmem:[%s2324_s0 + $0x90] ss:$8 sps:$4 sm:$0xff]   ;;  %v1708_v46 = vld [vmem:[%s2324_s0 + $0xa4] ss:$8 sps:$4 sm:$0xff]  }
  0x35   :  { %793 = vxpose.xlu0.c.b16.cont [5/8] (narrow) %v1734_v43, 16  ;;  %v1736_v47 = vld [vmem:[%s2326_s2 + $0x68] sm:$0xff]   ;;  %777 = vxpose.xlu1.c.b16.cont [5/8] (narrow) %v1735_v44, 16  ;;  %v1983_v50 = vld [vmem:[%s2324_s0 + $0xb4] ss:$8 sps:$4 sm:$0xff]   ;;  %vm34_vm0 = vcmask 31744  }
  0x36   :  { %v1737_v48 = vld [vmem:[%s2326_s2 + $0x28] sm:$0xff]   ;;  %824 = vmatpush1.bf16.msra.mxu1 %v1707_v45  ;;  %v1738_v51 = vld [vmem:[%s2326_s2 + $0x70] sm:$0xff]   ;;  %v1740_v55 = vld [vmem:[%s2326_s2 + $0x78] sm:$0xff]   ;;  %v1766_v0 = vmov 0.0   ;;  %vm972_vm1 = vcmask 1041408  }
  0x37   :  { %825 = vmatprep.subr.bf16.mxu1 %v1708_v46  ;;  %v1978_v49 = vld [vmem:[%s2324_s0 + $0xa0] ss:$8 sps:$4 sm:$0xff]   ;;  %v1739_v52 = vld [vmem:[%s2326_s2 + $0x30] sm:$0xff]   ;;  %v2001_v54 = vld [vmem:[%s2324_s0 + $0xc4] ss:$8 sps:$4 sm:$0xff]   ;;  %35 = vst.msk [vmem:[#allocation2] sm:$0xff] %vm34_vm0, %v1766_v0 }
  0x38   :  { %v1996_v53 = vld [vmem:[%s2324_s0 + $0xb0] ss:$8 sps:$4 sm:$0xff]   ;;  %v2016_v57 = vld [vmem:[%s2324_s0 + $0xc0] ss:$8 sps:$4 sm:$0xff]   ;;  %v2021_v58 = vld [vmem:[%s2324_s0 + $0xd4] ss:$8 sps:$4 sm:$0xff]  }
  0x39   :  { %794 = vxpose.xlu0.c.b16.cont [6/8] (narrow) %v1736_v47, 16  ;;  %778 = vxpose.xlu1.c.b16.cont [6/8] (narrow) %v1737_v48, 16  ;;  %v1741_v56 = vld [vmem:[%s2326_s2 + $0x38] sm:$0xff]   ;;  %v1720_v60 = vld [vmem:[%s2324_s0 + $0xe4] ss:$8 sps:$4 sm:$0xff]   ;;  %36 = vst.msk [vmem:[#allocation2 + $0x8] sm:$0xff] %vm34_vm0, %v1766_v0 }
  0x3a   :  { %476 = vmatmul.mubr.bf16.gmra.mrb[12].mxu0 %v1689_v23  ;;  %826 = vmatpush1.bf16.msra.mxu1 %v1978_v49  ;;  %v1719_v59 = vld [vmem:[%s2324_s0 + $0xd0] ss:$8 sps:$4 sm:$0xff]   ;;  %v2036_v61 = vld [vmem:[%s2324_s0 + $0xe0] ss:$8 sps:$4 sm:$0xff]   ;;  %v2041_v62 = vld [vmem:[%s2324_s0 + $0xf4] ss:$8 sps:$4 sm:$0xff]  }
  0x3b   :  { %483 = vmatprep.mubr.bf16.mxu0 %v1690_v24  ;;  %827 = vmatprep.subr.bf16.mxu1 %v1983_v50  ;;  %v2048_v63 = vld [vmem:[%s2324_s0 + $0xf0] ss:$8 sps:$4 sm:$0xff]   ;;  %30 = vst [vmem:[#allocation3] sm:$0xf] %v1766_v0  ;;  %37 = vst.msk [vmem:[#allocation2 + $0x10] sm:$0xff] %vm34_vm0, %v1766_v0 }
  0x3c   :  { %38 = vst.msk [vmem:[#allocation2 + $0x18] sm:$0xff] %vm34_vm0, %v1766_v0  ;;  %39 = vst.msk [vmem:[#allocation2 + $0x20] sm:$0xff] %vm34_vm0, %v1766_v0  ;;  %v916_v1 = vld [vmem:[%s2327_s3] sm:$0x3]  ;;  %s1768_s3 = smov [#allocation3]  }
  0x3d   :  { %795 = vxpose.xlu0.c.b16.cont [7/8] (narrow) %v1738_v51, 16  ;;  %779 = vxpose.xlu1.c.b16.cont [7/8] (narrow) %v1739_v52, 16  ;;  %40 = vst.msk [vmem:[#allocation2 + $0x28] sm:$0xff] %vm34_vm0, %v1766_v0  ;;  %41 = vst.msk [vmem:[#allocation2 + $0x30] sm:$0xff] %vm34_vm0, %v1766_v0  ;;  %v974_v3 = vsel %vm972_vm1, %v916_v1, 0  ;;  %s1338_s25 = sshll.u32 %s1768_s3, 4  ;;  %s1339_s25 = int_to_ptr.vmem [resolvable:$true] %s1338_s25 }
  0x3e   :  { %828 = vmatpush1.bf16.msra.mxu1 %v1996_v53  ;;  %42 = vst.msk [vmem:[#allocation2 + $0x38] sm:$0xff] %vm34_vm0, %v1766_v0  ;;  %43 = vst.msk [vmem:[#allocation2 + $0x40] sm:$0xff] %vm34_vm0, %v1766_v0  ;;  %v99_v6 = vld [vmem:[#allocation2] sm:$0xff]  ;;  %s1742_s26 = scalar_lea.vmem %s1339_s25, 64  ;;  %p1747_p1 = scmp.lt.s32.totalorder %s1339_s25, %s1339_s25 }
  0x3f   :  { %829 = vmatprep.subr.bf16.mxu1 %v2001_v54  ;;  %44 = vst.msk [vmem:[#allocation2 + $0x48] sm:$0xff] %vm34_vm0, %v1766_v0  ;;  %45 = vst.msk [vmem:[#allocation2 + $0x50] sm:$0xff] %vm34_vm0, %v1766_v0  ;;  %p1743_p0 = scmp.ne.s32.totalorder %s1339_s25, %s1742_s26  ;;  %p1748_p2 = scmp.lt.s32.totalorder %s1742_s26, %s1742_s26 }
  0x40   :  { %46 = vst.msk [vmem:[#allocation2 + $0x58] sm:$0xff] %vm34_vm0, %v1766_v0  ;;  %47 = vst.msk [vmem:[#allocation2 + $0x60] sm:$0xff] %vm34_vm0, %v1766_v0  ;;  %v100_v10 = vld [vmem:[#allocation2 + $0x8] sm:$0xff] }
  0x41   :  { %796 = vxpose.xlu0.c.b16.end [8/8] (narrow) %v1740_v55, 16  ;;  %780 = vxpose.xlu1.c.b16.end [8/8] (narrow) %v1741_v56, 16  ;;  %48 = vst.msk [vmem:[#allocation2 + $0x68] sm:$0xff] %vm34_vm0, %v1766_v0  ;;  %49 = vst.msk [vmem:[#allocation2 + $0x70] sm:$0xff] %vm34_vm0, %v1766_v0  ;;  %p1749_p3 = por %p1748_p2, %p1747_p1 }
  0x42   :  { %484 = vmatmul.mubr.bf16.gmra.mrb[16].mxu0 %v1882_v25  ;;  %830 = vmatpush1.bf16.msra.mxu1 %v2016_v57  ;;  %50 = vst.msk [vmem:[#allocation2 + $0x78] sm:$0xff] %vm34_vm0, %v1766_v0  ;;  %51 = vst.msk [vmem:[#allocation2 + $0x80] sm:$0xff] %vm34_vm0, %v1766_v0  ;;  %v101_v16 = vld [vmem:[#allocation2 + $0x10] sm:$0xff] }
  0x43   :  { %491 = vmatprep.mubr.bf16.mxu0 %v1887_v26  ;;  %831 = vmatprep.subr.bf16.mxu1 %v2021_v58  ;;  %52 = vst.msk [vmem:[#allocation2 + $0x88] sm:$0xff] %vm34_vm0, %v1766_v0  ;;  %53 = vst.msk [vmem:[#allocation2 + $0x90] sm:$0xff] %vm34_vm0, %v1766_v0  ;;  %v102_v20 = vld [vmem:[#allocation2 + $0x18] sm:$0xff]  ;;  %v103_v29 = vld [vmem:[#allocation2 + $0x20] sm:$0xff]  ;;  %p1750_p4 = pnand %p1749_p3, %p1743_p0 }
  0x44   :  { %54 = vst.msk [vmem:[#allocation2 + $0x98] sm:$0xff] %vm34_vm0, %v1766_v0  ;;  %55 = vst.msk [vmem:[#allocation2 + $0xa0] sm:$0xff] %vm34_vm0, %v1766_v0 }
  0x45   :  { %56 = vst.msk [vmem:[#allocation2 + $0xa8] sm:$0xff] %vm34_vm0, %v1766_v0  ;;  %57 = vst.msk [vmem:[#allocation2 + $0xb0] sm:$0xff] %vm34_vm0, %v1766_v0  ;;  %v107_v55 = vld [vmem:[#allocation2 + $0x40] sm:$0xff] }
  0x46   :  { %832 = vmatpush1.bf16.msra.mxu1 %v1719_v59  ;;  %58 = vst.msk [vmem:[#allocation2 + $0xb8] sm:$0xff] %vm34_vm0, %v1766_v0  ;;  %59 = vst.msk [vmem:[#allocation2 + $0xc0] sm:$0xff] %vm34_vm0, %v1766_v0 }
  0x47   :  { %833 = vmatprep.subr.bf16.mxu1 %v1720_v60  ;;  %60 = vst.msk [vmem:[#allocation2 + $0xc8] sm:$0xff] %vm34_vm0, %v1766_v0  ;;  %61 = vst.msk [vmem:[#allocation2 + $0xd0] sm:$0xff] %vm34_vm0, %v1766_v0 }
  0x48   :  { %62 = vst.msk [vmem:[#allocation2 + $0xd8] sm:$0xff] %vm34_vm0, %v1766_v0  ;;  %63 = vst.msk [vmem:[#allocation2 + $0xe0] sm:$0xff] %vm34_vm0, %v1766_v0 }
  0x49   :  { %64 = vst.msk [vmem:[#allocation2 + $0xe8] sm:$0xff] %vm34_vm0, %v1766_v0  ;;  %65 = vst.msk [vmem:[#allocation2 + $0xf0] sm:$0xff] %vm34_vm0, %v1766_v0 }
  0x4a   :  { %492 = vmatmul.mubr.bf16.gmra.mrb[20].mxu0 %v1892_v27  ;;  %834 = vmatpush1.bf16.msra.mxu1 %v2036_v61  ;;  %66 = vst.msk [vmem:[#allocation2 + $0xf8] sm:$0xff] %vm34_vm0, %v1766_v0 }
  0x4b   :  { %499 = vmatprep.mubr.bf16.mxu0 %v1898_v28  ;;  %835 = vmatprep.subr.bf16.mxu1 %v2041_v62 }
  0x4e   :  { %836 = vmatpush1.bf16.msra.mxu1 %v2048_v63 }
  0x4f   :  { %1658 = vmatprep.subr.msk.bf16.mxu1 %vm972_vm1, %v916_v1 }
  0x52   :  { %500 = vmatmul.mubr.bf16.gmra.mrb[24].mxu0 %v1917_v33  ;;  %v104_v33 = vld [vmem:[#allocation2 + $0x28] sm:$0xff] }
  0x53   :  { %507 = vmatprep.mubr.bf16.mxu0 %v1923_v34 }
  0x5a   :  { %508 = vmatmul.mubr.bf16.gmra.mrb[28].mxu0 %v1935_v37 }
  0x5b   :  { %515 = vmatprep.mubr.bf16.mxu0 %v1941_v38 }
  0x62   :  { %516 = vmatmul.mubr.bf16.gmra.mrb[32].mxu0 %v1704_v41 }
  0x63   :  { %523 = vmatprep.mubr.bf16.mxu0 %v1705_v42  ;;  %v105_v42 = vld [vmem:[#allocation2 + $0x30] sm:$0xff] }
  0x6a   :  { %524 = vmatmul.mubr.bf16.gmra.mrb[36].mxu0 %v1707_v45 }
  0x6b   :  { %531 = vmatprep.mubr.bf16.mxu0 %v1708_v46  ;;  %v106_v46 = vld [vmem:[#allocation2 + $0x38] sm:$0xff] }
  0x72   :  { %532 = vmatmul.mubr.bf16.gmra.mrb[40].mxu0 %v1978_v49 }
  0x73   :  { %539 = vmatprep.mubr.bf16.mxu0 %v1983_v50 }
  0x7a   :  { %540 = vmatmul.mubr.bf16.gmra.mrb[44].mxu0 %v1996_v53 }
  0x7b   :  { %547 = vmatprep.mubr.bf16.mxu0 %v2001_v54 }
  0x82   :  { %548 = vmatmul.mubr.bf16.gmra.mrb[48].mxu0 %v2016_v57 }
  0x83   :  { %555 = vmatprep.mubr.bf16.mxu0 %v2021_v58 }
  0x8a   :  { %556 = vmatmul.mubr.bf16.gmra.mrb[52].mxu0 %v1719_v59  ;;  %v108_v59 = vld [vmem:[#allocation2 + $0x48] sm:$0xff] }
  0x8b   :  { %563 = vmatprep.mubr.bf16.mxu0 %v1720_v60  ;;  %v797_v2 = vpop.trf.xlu0  ;;  %v781_v4 = vpop.trf.xlu1 }
  0x8c   :  { %837 = vmatprep.mubr.bf16.mxu1 %v797_v2 }
  0x8d   :  { %838 = vmatmul.mubr.bf16.vlgmr.msra.gmra.mrb[0].mxu1 %v781_v4  ;;  %v109_v4 = vld [vmem:[#allocation2 + $0x50] sm:$0xff] }
  0x8e   :  { %1625 = vmatpush3.bf16.msra.mxu1 %v974_v3 }
  0x92   :  { %564 = vmatmul.mubr.bf16.gmra.mrb[56].mxu0 %v2036_v61 }
  0x93   :  { %571 = vmatprep.mubr.bf16.mxu0 %v2041_v62 }
  0x9a   :  { %572 = vmatmul.mubr.bf16.gmra.mrb[60].mxu0 %v2048_v63 }
  0xf5   :  { %v1511_v5 = vpop.f32.mrb[0].mxu0 }
  0xf6   :  { %v1512_v7 = vpop.f32.mrb[1].mxu0 }
  0xf7   :  { %v1513_v8 = vadd.f32 %v1512_v7, %v1511_v5  ;;  %v1514_v9 = vpop.f32.mrb[2].mxu0 }
  0xf8   :  { %v1515_v11 = vpop.f32.mrb[3].mxu0 }
  0xf9   :  { %v580_v12 = vadd.f32 %v1513_v8, %v99_v6  ;;  %v1516_v13 = vadd.f32 %v1515_v11, %v1514_v9  ;;  %v110_v8 = vld [vmem:[#allocation2 + $0x58] sm:$0xff] }
  0xfb   :  { %613 = vst.msk [vmem:[#allocation2] sm:$0xff] %vm34_vm0, %v580_v12  ;;  %v581_v14 = vadd.f32 %v1516_v13, %v100_v10 }
  0xfd   :  { %614 = vst.msk [vmem:[#allocation2 + $0x8] sm:$0xff] %vm34_vm0, %v581_v14  ;;  %v1517_v15 = vpop.f32.mrb[4].mxu0 }
  0xfe   :  { %v1518_v17 = vpop.f32.mrb[5].mxu0 }
  0xff   :  { %v1519_v18 = vadd.f32 %v1518_v17, %v1517_v15  ;;  %v1520_v19 = vpop.f32.mrb[6].mxu0  ;;  %v111_v17 = vld [vmem:[#allocation2 + $0x60] sm:$0xff] }
 0x100   :  { %v1521_v21 = vpop.f32.mrb[7].mxu0 }
 0x101   :  { %v582_v22 = vadd.f32 %v1519_v18, %v101_v16  ;;  %v1522_v23 = vadd.f32 %v1521_v21, %v1520_v19  ;;  %v112_v21 = vld [vmem:[#allocation2 + $0x68] sm:$0xff] }
 0x102   :  { %v868_v25 = vld [vmem:[#allocation2] sm:$0xff] }
 0x103   :  { %615 = vst.msk [vmem:[#allocation2 + $0x10] sm:$0xff] %vm34_vm0, %v582_v22  ;;  %v583_v24 = vadd.f32 %v1522_v23, %v102_v20 }
 0x104   :  { %v869_v26 = vld [vmem:[#allocation2 + $0x8] sm:$0xff] }
 0x105   :  { %616 = vst.msk [vmem:[#allocation2 + $0x18] sm:$0xff] %vm34_vm0, %v583_v24  ;;  %v1523_v27 = vpop.f32.mrb[8].mxu0  ;;  %v900_v28 = vpack.c.bf16 %v869_v26, %v868_v25 }
 0x106   :  { %v1524_v30 = vpop.f32.mrb[9].mxu0 }
 0x107   :  { %v1525_v31 = vadd.f32 %v1524_v30, %v1523_v27  ;;  %v1526_v32 = vpop.f32.mrb[10].mxu0  ;;  %1626 = vmatprep.mubr.msk.bf16.mxu1 %vm34_vm0, %v900_v28  ;;  %v113_v30 = vld [vmem:[#allocation2 + $0x70] sm:$0xff] }
 0x108   :  { %v1527_v34 = vpop.f32.mrb[11].mxu0 }
 0x109   :  { %v584_v35 = vadd.f32 %v1525_v31, %v103_v29  ;;  %v1528_v36 = vadd.f32 %v1527_v34, %v1526_v32  ;;  %v114_v34 = vld [vmem:[#allocation2 + $0x78] sm:$0xff] }
 0x10a   :  { %v870_v38 = vld [vmem:[#allocation2 + $0x10] sm:$0xff] }
 0x10b   :  { %617 = vst.msk [vmem:[#allocation2 + $0x20] sm:$0xff] %vm34_vm0, %v584_v35  ;;  %v585_v37 = vadd.f32 %v1528_v36, %v104_v33 }
 0x10c   :  { %v871_v39 = vld [vmem:[#allocation2 + $0x18] sm:$0xff] }
 0x10d   :  { %618 = vst.msk [vmem:[#allocation2 + $0x28] sm:$0xff] %vm34_vm0, %v585_v37  ;;  %v1529_v40 = vpop.f32.mrb[12].mxu0  ;;  %v901_v41 = vpack.c.bf16 %v871_v39, %v870_v38 }
 0x10e   :  { %v1530_v43 = vpop.f32.mrb[13].mxu0 }
 0x10f   :  { %v1531_v44 = vadd.f32 %v1530_v43, %v1529_v40  ;;  %v1532_v45 = vpop.f32.mrb[14].mxu0  ;;  %1627 = vmatmul.mubr.msk.bf16.vlgmr.msra.gmra.mrb[4].mxu1 %vm34_vm0, %v901_v41  ;;  %v115_v43 = vld [vmem:[#allocation2 + $0x80] sm:$0xff] }
 0x110   :  { %v1533_v47 = vpop.f32.mrb[15].mxu0 }
 0x111   :  { %v586_v48 = vadd.f32 %v1531_v44, %v105_v42  ;;  %v1534_v49 = vadd.f32 %v1533_v47, %v1532_v45  ;;  %v116_v47 = vld [vmem:[#allocation2 + $0x88] sm:$0xff] }
 0x112   :  { %v872_v51 = vld [vmem:[#allocation2 + $0x20] sm:$0xff] }
 0x113   :  { %619 = vst.msk [vmem:[#allocation2 + $0x30] sm:$0xff] %vm34_vm0, %v586_v48  ;;  %v587_v50 = vadd.f32 %v1534_v49, %v106_v46 }
 0x114   :  { %v873_v52 = vld [vmem:[#allocation2 + $0x28] sm:$0xff] }
 0x115   :  { %620 = vst.msk [vmem:[#allocation2 + $0x38] sm:$0xff] %vm34_vm0, %v587_v50  ;;  %v1535_v53 = vpop.f32.mrb[16].mxu0  ;;  %v902_v54 = vpack.c.bf16 %v873_v52, %v872_v51 }
 0x116   :  { %v1536_v56 = vpop.f32.mrb[17].mxu0 }
 0x117   :  { %v1537_v57 = vadd.f32 %v1536_v56, %v1535_v53  ;;  %v1538_v58 = vpop.f32.mrb[18].mxu0  ;;  %1630 = vmatprep.mubr.msk.bf16.mxu1 %vm34_vm0, %v902_v54  ;;  %v117_v56 = vld [vmem:[#allocation2 + $0x90] sm:$0xff] }
 0x118   :  { %v1539_v60 = vpop.f32.mrb[19].mxu0 }
 0x119   :  { %v588_v61 = vadd.f32 %v1537_v57, %v107_v55  ;;  %v1540_v62 = vadd.f32 %v1539_v60, %v1538_v58  ;;  %v118_v60 = vld [vmem:[#allocation2 + $0x98] sm:$0xff] }
 0x11a   :  { %v874_v0 = vld [vmem:[#allocation2 + $0x30] sm:$0xff] }
 0x11b   :  { %621 = vst.msk [vmem:[#allocation2 + $0x40] sm:$0xff] %vm34_vm0, %v588_v61  ;;  %v589_v63 = vadd.f32 %v1540_v62, %v108_v59 }
 0x11c   :  { %v875_v1 = vld [vmem:[#allocation2 + $0x38] sm:$0xff] }
 0x11d   :  { %622 = vst.msk [vmem:[#allocation2 + $0x48] sm:$0xff] %vm34_vm0, %v589_v63  ;;  %v1541_v2 = vpop.f32.mrb[20].mxu0  ;;  %v903_v3 = vpack.c.bf16 %v875_v1, %v874_v0 }
 0x11e   :  { %v1542_v5 = vpop.f32.mrb[21].mxu0 }
 0x11f   :  { %v1543_v6 = vadd.f32 %v1542_v5, %v1541_v2  ;;  %v1544_v7 = vpop.f32.mrb[22].mxu0  ;;  %1631 = vmatmul.mubr.msk.bf16.gmra.mrb[8].mxu1 %vm34_vm0, %v903_v3  ;;  %v119_v5 = vld [vmem:[#allocation2 + $0xa0] sm:$0xff] }
 0x120   :  { %v1545_v9 = vpop.f32.mrb[23].mxu0 }
 0x121   :  { %v590_v10 = vadd.f32 %v1543_v6, %v109_v4  ;;  %v1546_v11 = vadd.f32 %v1545_v9, %v1544_v7  ;;  %v120_v9 = vld [vmem:[#allocation2 + $0xa8] sm:$0xff] }
 0x122   :  { %v876_v13 = vld [vmem:[#allocation2 + $0x40] sm:$0xff] }
 0x123   :  { %623 = vst.msk [vmem:[#allocation2 + $0x50] sm:$0xff] %vm34_vm0, %v590_v10  ;;  %v591_v12 = vadd.f32 %v1546_v11, %v110_v8 }
 0x124   :  { %v877_v14 = vld [vmem:[#allocation2 + $0x48] sm:$0xff] }
 0x125   :  { %624 = vst.msk [vmem:[#allocation2 + $0x58] sm:$0xff] %vm34_vm0, %v591_v12  ;;  %v1547_v15 = vpop.f32.mrb[24].mxu0  ;;  %v904_v16 = vpack.c.bf16 %v877_v14, %v876_v13 }
 0x126   :  { %v1548_v18 = vpop.f32.mrb[25].mxu0 }
 0x127   :  { %v1549_v19 = vadd.f32 %v1548_v18, %v1547_v15  ;;  %v1550_v20 = vpop.f32.mrb[26].mxu0  ;;  %1634 = vmatprep.mubr.msk.bf16.mxu1 %vm34_vm0, %v904_v16  ;;  %v121_v18 = vld [vmem:[#allocation2 + $0xb0] sm:$0xff] }
 0x128   :  { %v1551_v22 = vpop.f32.mrb[27].mxu0 }
 0x129   :  { %v592_v23 = vadd.f32 %v1549_v19, %v111_v17  ;;  %v1552_v24 = vadd.f32 %v1551_v22, %v1550_v20  ;;  %v122_v22 = vld [vmem:[#allocation2 + $0xb8] sm:$0xff] }
 0x12a   :  { %v878_v26 = vld [vmem:[#allocation2 + $0x50] sm:$0xff] }
 0x12b   :  { %625 = vst.msk [vmem:[#allocation2 + $0x60] sm:$0xff] %vm34_vm0, %v592_v23  ;;  %v593_v25 = vadd.f32 %v1552_v24, %v112_v21 }
 0x12c   :  { %v879_v27 = vld [vmem:[#allocation2 + $0x58] sm:$0xff] }
 0x12d   :  { %626 = vst.msk [vmem:[#allocation2 + $0x68] sm:$0xff] %vm34_vm0, %v593_v25  ;;  %v1553_v28 = vpop.f32.mrb[28].mxu0  ;;  %v905_v29 = vpack.c.bf16 %v879_v27, %v878_v26 }
 0x12e   :  { %v1554_v31 = vpop.f32.mrb[29].mxu0 }
 0x12f   :  { %v1555_v32 = vadd.f32 %v1554_v31, %v1553_v28  ;;  %v1556_v33 = vpop.f32.mrb[30].mxu0  ;;  %1635 = vmatmul.mubr.msk.bf16.gmra.mrb[12].mxu1 %vm34_vm0, %v905_v29  ;;  %v123_v31 = vld [vmem:[#allocation2 + $0xc0] sm:$0xff] }
 0x130   :  { %v1557_v35 = vpop.f32.mrb[31].mxu0 }
 0x131   :  { %v594_v36 = vadd.f32 %v1555_v32, %v113_v30  ;;  %v1558_v37 = vadd.f32 %v1557_v35, %v1556_v33  ;;  %v124_v35 = vld [vmem:[#allocation2 + $0xc8] sm:$0xff] }
 0x132   :  { %v880_v39 = vld [vmem:[#allocation2 + $0x60] sm:$0xff] }
 0x133   :  { %627 = vst.msk [vmem:[#allocation2 + $0x70] sm:$0xff] %vm34_vm0, %v594_v36  ;;  %v595_v38 = vadd.f32 %v1558_v37, %v114_v34 }
 0x134   :  { %v881_v40 = vld [vmem:[#allocation2 + $0x68] sm:$0xff] }
 0x135   :  { %628 = vst.msk [vmem:[#allocation2 + $0x78] sm:$0xff] %vm34_vm0, %v595_v38  ;;  %v1559_v41 = vpop.f32.mrb[32].mxu0  ;;  %v906_v42 = vpack.c.bf16 %v881_v40, %v880_v39 }
 0x136   :  { %v1560_v44 = vpop.f32.mrb[33].mxu0 }
 0x137   :  { %v1561_v45 = vadd.f32 %v1560_v44, %v1559_v41  ;;  %v1562_v46 = vpop.f32.mrb[34].mxu0  ;;  %1638 = vmatprep.mubr.msk.bf16.mxu1 %vm34_vm0, %v906_v42  ;;  %v125_v44 = vld [vmem:[#allocation2 + $0xd0] sm:$0xff] }
 0x138   :  { %v1563_v48 = vpop.f32.mrb[35].mxu0 }
 0x139   :  { %v596_v49 = vadd.f32 %v1561_v45, %v115_v43  ;;  %v1564_v50 = vadd.f32 %v1563_v48, %v1562_v46  ;;  %v126_v48 = vld [vmem:[#allocation2 + $0xd8] sm:$0xff] }
 0x13a   :  { %v882_v52 = vld [vmem:[#allocation2 + $0x70] sm:$0xff] }
 0x13b   :  { %629 = vst.msk [vmem:[#allocation2 + $0x80] sm:$0xff] %vm34_vm0, %v596_v49  ;;  %v597_v51 = vadd.f32 %v1564_v50, %v116_v47 }
 0x13c   :  { %v883_v53 = vld [vmem:[#allocation2 + $0x78] sm:$0xff] }
 0x13d   :  { %630 = vst.msk [vmem:[#allocation2 + $0x88] sm:$0xff] %vm34_vm0, %v597_v51  ;;  %v1565_v54 = vpop.f32.mrb[36].mxu0  ;;  %v907_v55 = vpack.c.bf16 %v883_v53, %v882_v52 }
 0x13e   :  { %v1566_v57 = vpop.f32.mrb[37].mxu0 }
 0x13f   :  { %v1567_v58 = vadd.f32 %v1566_v57, %v1565_v54  ;;  %v1568_v59 = vpop.f32.mrb[38].mxu0  ;;  %1639 = vmatmul.mubr.msk.bf16.gmra.mrb[16].mxu1 %vm34_vm0, %v907_v55 }
 0x140   :  { %v1569_v61 = vpop.f32.mrb[39].mxu0 }
 0x141   :  { %v598_v62 = vadd.f32 %v1567_v58, %v117_v56  ;;  %v1570_v63 = vadd.f32 %v1569_v61, %v1568_v59  ;;  %v127_v61 = vld [vmem:[#allocation2 + $0xe0] sm:$0xff] }
 0x142   :  { %v884_v1 = vld [vmem:[#allocation2 + $0x80] sm:$0xff] }
 0x143   :  { %631 = vst.msk [vmem:[#allocation2 + $0x90] sm:$0xff] %vm34_vm0, %v598_v62  ;;  %v599_v0 = vadd.f32 %v1570_v63, %v118_v60 }
 0x144   :  { %v885_v2 = vld [vmem:[#allocation2 + $0x88] sm:$0xff] }
 0x145   :  { %632 = vst.msk [vmem:[#allocation2 + $0x98] sm:$0xff] %vm34_vm0, %v599_v0  ;;  %v1571_v3 = vpop.f32.mrb[40].mxu0  ;;  %v908_v4 = vpack.c.bf16 %v885_v2, %v884_v1  ;;  %v128_v2 = vld [vmem:[#allocation2 + $0xe8] sm:$0xff] }
 0x146   :  { %v1572_v6 = vpop.f32.mrb[41].mxu0 }
 0x147   :  { %v1573_v7 = vadd.f32 %v1572_v6, %v1571_v3  ;;  %v1574_v8 = vpop.f32.mrb[42].mxu0  ;;  %1642 = vmatprep.mubr.msk.bf16.mxu1 %vm34_vm0, %v908_v4 }
 0x148   :  { %v1575_v10 = vpop.f32.mrb[43].mxu0 }
 0x149   :  { %v600_v11 = vadd.f32 %v1573_v7, %v119_v5  ;;  %v1576_v12 = vadd.f32 %v1575_v10, %v1574_v8 }
 0x14a   :  { %v886_v14 = vld [vmem:[#allocation2 + $0x90] sm:$0xff] }
 0x14b   :  { %633 = vst.msk [vmem:[#allocation2 + $0xa0] sm:$0xff] %vm34_vm0, %v600_v11  ;;  %v601_v13 = vadd.f32 %v1576_v12, %v120_v9  ;;  %v129_v11 = vld [vmem:[#allocation2 + $0xf0] sm:$0xff] }
 0x14c   :  { %v887_v15 = vld [vmem:[#allocation2 + $0x98] sm:$0xff] }
 0x14d   :  { %634 = vst.msk [vmem:[#allocation2 + $0xa8] sm:$0xff] %vm34_vm0, %v601_v13  ;;  %v1577_v16 = vpop.f32.mrb[44].mxu0  ;;  %v909_v17 = vpack.c.bf16 %v887_v15, %v886_v14  ;;  %v130_v15 = vld [vmem:[#allocation2 + $0xf8] sm:$0xff] }
 0x14e   :  { %v1578_v19 = vpop.f32.mrb[45].mxu0 }
 0x14f   :  { %v1579_v20 = vadd.f32 %v1578_v19, %v1577_v16  ;;  %v1580_v21 = vpop.f32.mrb[46].mxu0  ;;  %1643 = vmatmul.mubr.msk.bf16.gmra.mrb[20].mxu1 %vm34_vm0, %v909_v17 }
 0x150   :  { %v1581_v23 = vpop.f32.mrb[47].mxu0 }
 0x151   :  { %v602_v24 = vadd.f32 %v1579_v20, %v121_v18  ;;  %v1582_v25 = vadd.f32 %v1581_v23, %v1580_v21 }
 0x152   :  { %v888_v27 = vld [vmem:[#allocation2 + $0xa0] sm:$0xff] }
 0x153   :  { %635 = vst.msk [vmem:[#allocation2 + $0xb0] sm:$0xff] %vm34_vm0, %v602_v24  ;;  %v603_v26 = vadd.f32 %v1582_v25, %v122_v22 }
 0x154   :  { %v889_v28 = vld [vmem:[#allocation2 + $0xa8] sm:$0xff] }
 0x155   :  { %636 = vst.msk [vmem:[#allocation2 + $0xb8] sm:$0xff] %vm34_vm0, %v603_v26  ;;  %v1583_v29 = vpop.f32.mrb[48].mxu0  ;;  %v910_v30 = vpack.c.bf16 %v889_v28, %v888_v27  ;;  %v1767_v26 = vmov 1983009808   ;;  %v858_v28 = vlaneseq }
 0x156   :  { %v1584_v32 = vpop.f32.mrb[49].mxu0  ;;  %v856_v27 = vunpack.c.l.s4 %v1767_v26 }
 0x157   :  { %v1585_v33 = vadd.f32 %v1584_v32, %v1583_v29  ;;  %v1586_v34 = vpop.f32.mrb[50].mxu0  ;;  %1646 = vmatprep.mubr.msk.bf16.mxu1 %vm34_vm0, %v910_v30  ;;  %v859_v30 = vshrl.u32 %v858_v28, 7 }
 0x158   :  { %v1587_v36 = vpop.f32.mrb[51].mxu0  ;;  %v857_v29 = vunpack.c.0.s8 %v856_v27 }
 0x159   :  { %v604_v37 = vadd.f32 %v1585_v33, %v123_v31  ;;  %v1588_v38 = vadd.f32 %v1587_v36, %v1586_v34  ;;  %v851_v33 = vld [vmem:[#allocation3] sm:$0xf] }
 0x15a   :  { %v890_v40 = vld [vmem:[#allocation2 + $0xb0] sm:$0xff]  ;;  %v860_v31 = vsub.s32 %v857_v29, %v859_v30 }
 0x15b   :  { %637 = vst.msk [vmem:[#allocation2 + $0xc0] sm:$0xff] %vm34_vm0, %v604_v37  ;;  %v605_v39 = vadd.f32 %v1588_v38, %v124_v35 }
 0x15c   :  { %v891_v41 = vld [vmem:[#allocation2 + $0xb8] sm:$0xff] }
 0x15d   :  { %638 = vst.msk [vmem:[#allocation2 + $0xc8] sm:$0xff] %vm34_vm0, %v605_v39  ;;  %v1589_v42 = vpop.f32.mrb[52].mxu0  ;;  %v911_v43 = vpack.c.bf16 %v891_v41, %v890_v40 }
 0x15e   :  { %v1590_v45 = vpop.f32.mrb[53].mxu0 }
 0x15f   :  { %v1591_v46 = vadd.f32 %v1590_v45, %v1589_v42  ;;  %v1592_v47 = vpop.f32.mrb[54].mxu0  ;;  %1647 = vmatmul.mubr.msk.bf16.gmra.mrb[24].mxu1 %vm34_vm0, %v911_v43 }
 0x160   :  { %v1593_v49 = vpop.f32.mrb[55].mxu0  ;;  %v839_v53 = vpop.f32.mrb[0].mxu1 }
 0x161   :  { %v606_v50 = vadd.f32 %v1591_v46, %v125_v44  ;;  %v1594_v51 = vadd.f32 %v1593_v49, %v1592_v47  ;;  %v841_v56 = vpop.f32.mrb[1].mxu1 }
 0x162   :  { %v892_v54 = vld [vmem:[#allocation2 + $0xc0] sm:$0xff]  ;;  %v854_v59 = vcombine.low %v839_v53, %v841_v56  ;;  %v843_v60 = vpop.f32.mrb[2].mxu1 }
 0x163   :  { %639 = vst.msk [vmem:[#allocation2 + $0xd0] sm:$0xff] %vm34_vm0, %v606_v50  ;;  %v607_v52 = vadd.f32 %v1594_v51, %v126_v48  ;;  %v844_v63 = vpop.f32.mrb[3].mxu1 }
 0x164   :  { %v893_v55 = vld [vmem:[#allocation2 + $0xc8] sm:$0xff]  ;;  %v861_v32 = vrot.slane %v854_v59, %v860_v31 }
 0x165   :  { %640 = vst.msk [vmem:[#allocation2 + $0xd8] sm:$0xff] %vm34_vm0, %v607_v52  ;;  %v1595_v57 = vpop.f32.mrb[56].mxu0  ;;  %v912_v58 = vpack.c.bf16 %v893_v55, %v892_v54 }
 0x166   :  { %v1596_v62 = vpop.f32.mrb[57].mxu0  ;;  %v863_v34 = vadd.f32 %v861_v32, %v851_v33 }
 0x167   :  { %v1597_v0 = vadd.f32 %v1596_v62, %v1595_v57  ;;  %v1598_v1 = vpop.f32.mrb[58].mxu0  ;;  %1650 = vmatprep.mubr.msk.bf16.mxu1 %vm34_vm0, %v912_v58 }
 0x168   :  { %v1599_v3 = vpop.f32.mrb[59].mxu0  ;;  %864 = vst [vmem:[#allocation3] sm:$0xf] %v863_v34 }
 0x169   :  { %v608_v4 = vadd.f32 %v1597_v0, %v127_v61  ;;  %v1600_v5 = vadd.f32 %v1599_v3, %v1598_v1 }
 0x16a   :  { %v894_v7 = vld [vmem:[#allocation2 + $0xd0] sm:$0xff] }
 0x16b   :  { %641 = vst.msk [vmem:[#allocation2 + $0xe0] sm:$0xff] %vm34_vm0, %v608_v4  ;;  %v609_v6 = vadd.f32 %v1600_v5, %v128_v2 }
 0x16c   :  { %v895_v8 = vld [vmem:[#allocation2 + $0xd8] sm:$0xff] }
 0x16d   :  { %642 = vst.msk [vmem:[#allocation2 + $0xe8] sm:$0xff] %vm34_vm0, %v609_v6  ;;  %v1601_v9 = vpop.f32.mrb[60].mxu0  ;;  %v913_v10 = vpack.c.bf16 %v895_v8, %v894_v7 }
 0x16e   :  { %v1602_v12 = vpop.f32.mrb[61].mxu0 }
 0x16f   :  { %v1603_v13 = vadd.f32 %v1602_v12, %v1601_v9  ;;  %v1604_v14 = vpop.f32.mrb[62].mxu0  ;;  %1651 = vmatmul.mubr.msk.bf16.gmra.mrb[28].mxu1 %vm34_vm0, %v913_v10 }
 0x170   :  { %v1605_v16 = vpop.f32.mrb[63].mxu0 }
 0x171   :  { %v610_v17 = vadd.f32 %v1603_v13, %v129_v11  ;;  %v1606_v18 = vadd.f32 %v1605_v16, %v1604_v14 }
 0x172   :  { %v896_v20 = vld [vmem:[#allocation2 + $0xe0] sm:$0xff] }
 0x173   :  { %643 = vst.msk [vmem:[#allocation2 + $0xf0] sm:$0xff] %vm34_vm0, %v610_v17  ;;  %v611_v19 = vadd.f32 %v1606_v18, %v130_v15 }
 0x174   :  { %v897_v21 = vld [vmem:[#allocation2 + $0xe8] sm:$0xff] }
 0x175   :  { %644 = vst.msk [vmem:[#allocation2 + $0xf8] sm:$0xff] %vm34_vm0, %v611_v19  ;;  %v914_v22 = vpack.c.bf16 %v897_v21, %v896_v20 }
 0x177   :  { %1654 = vmatprep.mubr.msk.bf16.mxu1 %vm34_vm0, %v914_v22 }
 0x17a   :  { %v898_v23 = vld [vmem:[#allocation2 + $0xf0] sm:$0xff] }
 0x17c   :  { %v899_v24 = vld [vmem:[#allocation2 + $0xf8] sm:$0xff] }
 0x17d   :  { %v915_v25 = vpack.c.bf16 %v899_v24, %v898_v23 }
 0x17f   :  { %1655 = vmatmul.mubr.msk.bf16.gmra.mrb[32].mxu1 %vm34_vm0, %v915_v25 }
 0x180   :  { %1753 = shalt.err (!%p1750_p4)
}
 0x181   :  { %s1754_s29 = scalar_lea.hbm %s2330_s6, 64 }
 0x182   :  { %p1755_p5 = scmp.ne.s32.totalorder %s2330_s6, %s1754_s29  ;;  %p1758_p6 = scmp.lt.u32.totalorder %s1754_s29, %s2330_s6 }
 0x184   :  { %p1760_p7 = pnand %p1758_p6, %p1755_p5 }
 0x186   :  { %1763 = shalt.err (!%p1760_p7)
}
 0x187   :  { %1341 = dma.vmem_to_hbm [thread:$0]  %s1339_s25, 64, %s2330_s6, [#allocation4]   ;;  %v2162_v35 = vld [vmem:[%s2328_s4] ss:$0 sm:$0xff]  ;;  %vm1297_vm2 = vcmask 257024  }
 0x1e2   :  { %v1628_v36 = vpop.f32.mrb[4].mxu1 }
 0x1e3   :  { %v1019_v37 = vadd.f32 %v1628_v36, %v2162_v35  ;;  %v1010_v38 = vpop.f32.mrb[5].mxu1 }
 0x1e4   :  { %v1011_v39 = vadd.f32 %v2162_v35, %v1010_v38  ;;  %v1629_v40 = vpop.f32.mrb[6].mxu1 }
 0x1e5   :  { %v1139_v41 = vmax.f32 %v1019_v37, 0.0  ;;  %v1022_v42 = vadd.f32 %v1629_v40, %v2162_v35  ;;  %v1013_v43 = vpop.f32.mrb[7].mxu1 }
 0x1e6   :  { %v1137_v44 = vmax.f32 %v1011_v39, 0.0  ;;  %v1014_v45 = vadd.f32 %v2162_v35, %v1013_v43 }
 0x1e7   :  { %v1465_v46 = vpack.c.bf16 %v1139_v41, %v1139_v41  ;;  %v1140_v47 = vmax.f32 %v1022_v42, 0.0 }
 0x1e8   :  { %v1463_v48 = vpack.c.bf16 %v1137_v44, %v1137_v44  ;;  %v1138_v49 = vmax.f32 %v1014_v45, 0.0 }
 0x1e9   :  { %1300 = vst.msk [vmem:[%s2329_s5 + $0x8] sm:$0xf] %vm1297_vm2, %v1465_v46  ;;  %v1466_v50 = vpack.c.bf16 %v1140_v47, %v1140_v47 }
 0x1ea   :  { %1298 = vst.msk [vmem:[%s2329_s5] sm:$0xf] %vm1297_vm2, %v1463_v48  ;;  %v1464_v51 = vpack.c.bf16 %v1138_v49, %v1138_v49 }
 0x1eb   :  { %1301 = vst.msk [vmem:[%s2329_s5 + $0xc] sm:$0xf] %vm1297_vm2, %v1466_v50 }
 0x1ec   :  { %1299 = vst.msk [vmem:[%s2329_s5 + $0x4] sm:$0xf] %vm1297_vm2, %v1464_v51 }
 0x1f2   :  { %v1632_v52 = vpop.f32.mrb[8].mxu1 }
 0x1f3   :  { %v1035_v53 = vadd.f32 %v1632_v52, %v2162_v35  ;;  %v1026_v54 = vpop.f32.mrb[9].mxu1 }
 0x1f4   :  { %v1027_v55 = vadd.f32 %v2162_v35, %v1026_v54  ;;  %v1633_v56 = vpop.f32.mrb[10].mxu1 }
 0x1f5   :  { %v1143_v57 = vmax.f32 %v1035_v53, 0.0  ;;  %v1038_v58 = vadd.f32 %v1633_v56, %v2162_v35  ;;  %v1029_v59 = vpop.f32.mrb[11].mxu1 }
 0x1f6   :  { %v1141_v60 = vmax.f32 %v1027_v55, 0.0  ;;  %v1030_v61 = vadd.f32 %v2162_v35, %v1029_v59 }
 0x1f7   :  { %v1469_v62 = vpack.c.bf16 %v1143_v57, %v1143_v57  ;;  %v1144_v63 = vmax.f32 %v1038_v58, 0.0 }
 0x1f8   :  { %v1467_v0 = vpack.c.bf16 %v1141_v60, %v1141_v60  ;;  %v1142_v1 = vmax.f32 %v1030_v61, 0.0 }
 0x1f9   :  { %1304 = vst.msk [vmem:[%s2329_s5 + $0x18] sm:$0xf] %vm1297_vm2, %v1469_v62  ;;  %v1470_v2 = vpack.c.bf16 %v1144_v63, %v1144_v63 }
 0x1fa   :  { %1302 = vst.msk [vmem:[%s2329_s5 + $0x10] sm:$0xf] %vm1297_vm2, %v1467_v0  ;;  %v1468_v3 = vpack.c.bf16 %v1142_v1, %v1142_v1 }
 0x1fb   :  { %1305 = vst.msk [vmem:[%s2329_s5 + $0x1c] sm:$0xf] %vm1297_vm2, %v1470_v2 }
 0x1fc   :  { %1303 = vst.msk [vmem:[%s2329_s5 + $0x14] sm:$0xf] %vm1297_vm2, %v1468_v3 }
 0x202   :  { %v1636_v4 = vpop.f32.mrb[12].mxu1 }
 0x203   :  { %v1051_v5 = vadd.f32 %v1636_v4, %v2162_v35  ;;  %v1042_v6 = vpop.f32.mrb[13].mxu1 }
 0x204   :  { %v1043_v7 = vadd.f32 %v2162_v35, %v1042_v6  ;;  %v1637_v8 = vpop.f32.mrb[14].mxu1 }
 0x205   :  { %v1147_v9 = vmax.f32 %v1051_v5, 0.0  ;;  %v1054_v10 = vadd.f32 %v1637_v8, %v2162_v35  ;;  %v1045_v11 = vpop.f32.mrb[15].mxu1 }
 0x206   :  { %v1145_v12 = vmax.f32 %v1043_v7, 0.0  ;;  %v1046_v13 = vadd.f32 %v2162_v35, %v1045_v11 }
 0x207   :  { %v1473_v14 = vpack.c.bf16 %v1147_v9, %v1147_v9  ;;  %v1148_v15 = vmax.f32 %v1054_v10, 0.0 }
 0x208   :  { %v1471_v16 = vpack.c.bf16 %v1145_v12, %v1145_v12  ;;  %v1146_v17 = vmax.f32 %v1046_v13, 0.0 }
 0x209   :  { %1308 = vst.msk [vmem:[%s2329_s5 + $0x28] sm:$0xf] %vm1297_vm2, %v1473_v14  ;;  %v1474_v18 = vpack.c.bf16 %v1148_v15, %v1148_v15 }
 0x20a   :  { %1306 = vst.msk [vmem:[%s2329_s5 + $0x20] sm:$0xf] %vm1297_vm2, %v1471_v16  ;;  %v1472_v19 = vpack.c.bf16 %v1146_v17, %v1146_v17 }
 0x20b   :  { %1309 = vst.msk [vmem:[%s2329_s5 + $0x2c] sm:$0xf] %vm1297_vm2, %v1474_v18 }
 0x20c   :  { %1307 = vst.msk [vmem:[%s2329_s5 + $0x24] sm:$0xf] %vm1297_vm2, %v1472_v19 }
 0x212   :  { %v1640_v20 = vpop.f32.mrb[16].mxu1 }
 0x213   :  { %v1067_v21 = vadd.f32 %v1640_v20, %v2162_v35  ;;  %v1058_v22 = vpop.f32.mrb[17].mxu1 }
 0x214   :  { %v1059_v23 = vadd.f32 %v2162_v35, %v1058_v22  ;;  %v1641_v24 = vpop.f32.mrb[18].mxu1 }
 0x215   :  { %v1151_v25 = vmax.f32 %v1067_v21, 0.0  ;;  %v1070_v26 = vadd.f32 %v1641_v24, %v2162_v35  ;;  %v1061_v27 = vpop.f32.mrb[19].mxu1 }
 0x216   :  { %v1149_v28 = vmax.f32 %v1059_v23, 0.0  ;;  %v1062_v29 = vadd.f32 %v2162_v35, %v1061_v27 }
 0x217   :  { %v1477_v30 = vpack.c.bf16 %v1151_v25, %v1151_v25  ;;  %v1152_v31 = vmax.f32 %v1070_v26, 0.0 }
 0x218   :  { %v1475_v32 = vpack.c.bf16 %v1149_v28, %v1149_v28  ;;  %v1150_v33 = vmax.f32 %v1062_v29, 0.0 }
 0x219   :  { %1312 = vst.msk [vmem:[%s2329_s5 + $0x38] sm:$0xf] %vm1297_vm2, %v1477_v30  ;;  %v1478_v34 = vpack.c.bf16 %v1152_v31, %v1152_v31 }
 0x21a   :  { %1310 = vst.msk [vmem:[%s2329_s5 + $0x30] sm:$0xf] %vm1297_vm2, %v1475_v32  ;;  %v1476_v36 = vpack.c.bf16 %v1150_v33, %v1150_v33 }
 0x21b   :  { %1313 = vst.msk [vmem:[%s2329_s5 + $0x3c] sm:$0xf] %vm1297_vm2, %v1478_v34 }
 0x21c   :  { %1311 = vst.msk [vmem:[%s2329_s5 + $0x34] sm:$0xf] %vm1297_vm2, %v1476_v36 }
 0x222   :  { %v1644_v37 = vpop.f32.mrb[20].mxu1 }
 0x223   :  { %v1083_v38 = vadd.f32 %v1644_v37, %v2162_v35  ;;  %v1074_v39 = vpop.f32.mrb[21].mxu1 }
 0x224   :  { %v1075_v40 = vadd.f32 %v2162_v35, %v1074_v39  ;;  %v1645_v41 = vpop.f32.mrb[22].mxu1 }
 0x225   :  { %v1155_v42 = vmax.f32 %v1083_v38, 0.0  ;;  %v1086_v43 = vadd.f32 %v1645_v41, %v2162_v35  ;;  %v1077_v44 = vpop.f32.mrb[23].mxu1 }
 0x226   :  { %v1153_v45 = vmax.f32 %v1075_v40, 0.0  ;;  %v1078_v46 = vadd.f32 %v2162_v35, %v1077_v44 }
 0x227   :  { %v1481_v47 = vpack.c.bf16 %v1155_v42, %v1155_v42  ;;  %v1156_v48 = vmax.f32 %v1086_v43, 0.0 }
 0x228   :  { %v1479_v49 = vpack.c.bf16 %v1153_v45, %v1153_v45  ;;  %v1154_v50 = vmax.f32 %v1078_v46, 0.0 }
 0x229   :  { %1316 = vst.msk [vmem:[%s2329_s5 + $0x48] sm:$0xf] %vm1297_vm2, %v1481_v47  ;;  %v1482_v51 = vpack.c.bf16 %v1156_v48, %v1156_v48 }
 0x22a   :  { %1314 = vst.msk [vmem:[%s2329_s5 + $0x40] sm:$0xf] %vm1297_vm2, %v1479_v49  ;;  %v1480_v52 = vpack.c.bf16 %v1154_v50, %v1154_v50 }
 0x22b   :  { %1317 = vst.msk [vmem:[%s2329_s5 + $0x4c] sm:$0xf] %vm1297_vm2, %v1482_v51 }
 0x22c   :  { %1315 = vst.msk [vmem:[%s2329_s5 + $0x44] sm:$0xf] %vm1297_vm2, %v1480_v52 }
 0x232   :  { %v1648_v53 = vpop.f32.mrb[24].mxu1 }
 0x233   :  { %v1099_v54 = vadd.f32 %v1648_v53, %v2162_v35  ;;  %v1090_v55 = vpop.f32.mrb[25].mxu1 }
 0x234   :  { %v1091_v56 = vadd.f32 %v2162_v35, %v1090_v55  ;;  %v1649_v57 = vpop.f32.mrb[26].mxu1 }
 0x235   :  { %v1159_v58 = vmax.f32 %v1099_v54, 0.0  ;;  %v1102_v59 = vadd.f32 %v1649_v57, %v2162_v35  ;;  %v1093_v60 = vpop.f32.mrb[27].mxu1 }
 0x236   :  { %v1157_v61 = vmax.f32 %v1091_v56, 0.0  ;;  %v1094_v62 = vadd.f32 %v2162_v35, %v1093_v60 }
 0x237   :  { %v1485_v63 = vpack.c.bf16 %v1159_v58, %v1159_v58  ;;  %v1160_v0 = vmax.f32 %v1102_v59, 0.0 }
 0x238   :  { %v1483_v1 = vpack.c.bf16 %v1157_v61, %v1157_v61  ;;  %v1158_v2 = vmax.f32 %v1094_v62, 0.0 }
 0x239   :  { %1320 = vst.msk [vmem:[%s2329_s5 + $0x58] sm:$0xf] %vm1297_vm2, %v1485_v63  ;;  %v1486_v3 = vpack.c.bf16 %v1160_v0, %v1160_v0 }
 0x23a   :  { %1318 = vst.msk [vmem:[%s2329_s5 + $0x50] sm:$0xf] %vm1297_vm2, %v1483_v1  ;;  %v1484_v4 = vpack.c.bf16 %v1158_v2, %v1158_v2 }
 0x23b   :  { %1321 = vst.msk [vmem:[%s2329_s5 + $0x5c] sm:$0xf] %vm1297_vm2, %v1486_v3 }
 0x23c   :  { %1319 = vst.msk [vmem:[%s2329_s5 + $0x54] sm:$0xf] %vm1297_vm2, %v1484_v4 }
 0x242   :  { %v1652_v5 = vpop.f32.mrb[28].mxu1 }
 0x243   :  { %v1115_v6 = vadd.f32 %v1652_v5, %v2162_v35  ;;  %v1106_v7 = vpop.f32.mrb[29].mxu1 }
 0x244   :  { %v1107_v8 = vadd.f32 %v2162_v35, %v1106_v7  ;;  %v1653_v9 = vpop.f32.mrb[30].mxu1 }
 0x245   :  { %v1163_v10 = vmax.f32 %v1115_v6, 0.0  ;;  %v1118_v11 = vadd.f32 %v1653_v9, %v2162_v35  ;;  %v1109_v12 = vpop.f32.mrb[31].mxu1 }
 0x246   :  { %v1161_v13 = vmax.f32 %v1107_v8, 0.0  ;;  %v1110_v14 = vadd.f32 %v2162_v35, %v1109_v12 }
 0x247   :  { %v1489_v15 = vpack.c.bf16 %v1163_v10, %v1163_v10  ;;  %v1164_v16 = vmax.f32 %v1118_v11, 0.0 }
 0x248   :  { %v1487_v17 = vpack.c.bf16 %v1161_v13, %v1161_v13  ;;  %v1162_v18 = vmax.f32 %v1110_v14, 0.0 }
 0x249   :  { %1324 = vst.msk [vmem:[%s2329_s5 + $0x68] sm:$0xf] %vm1297_vm2, %v1489_v15  ;;  %v1490_v19 = vpack.c.bf16 %v1164_v16, %v1164_v16 }
 0x24a   :  { %1322 = vst.msk [vmem:[%s2329_s5 + $0x60] sm:$0xf] %vm1297_vm2, %v1487_v17  ;;  %v1488_v20 = vpack.c.bf16 %v1162_v18, %v1162_v18 }
 0x24b   :  { %1325 = vst.msk [vmem:[%s2329_s5 + $0x6c] sm:$0xf] %vm1297_vm2, %v1490_v19 }
 0x24c   :  { %1323 = vst.msk [vmem:[%s2329_s5 + $0x64] sm:$0xf] %vm1297_vm2, %v1488_v20 }
 0x252   :  { %v1656_v21 = vpop.f32.mrb[32].mxu1 }
 0x253   :  { %v1131_v22 = vadd.f32 %v1656_v21, %v2162_v35  ;;  %v1122_v23 = vpop.f32.mrb[33].mxu1 }
 0x254   :  { %v1123_v24 = vadd.f32 %v2162_v35, %v1122_v23  ;;  %v1657_v25 = vpop.f32.mrb[34].mxu1 }
 0x255   :  { %v1167_v26 = vmax.f32 %v1131_v22, 0.0  ;;  %v1134_v27 = vadd.f32 %v1657_v25, %v2162_v35  ;;  %v1125_v28 = vpop.f32.mrb[35].mxu1 }
 0x256   :  { %v1165_v29 = vmax.f32 %v1123_v24, 0.0  ;;  %v1126_v30 = vadd.f32 %v2162_v35, %v1125_v28 }
 0x257   :  { %v1493_v31 = vpack.c.bf16 %v1167_v26, %v1167_v26  ;;  %v1168_v32 = vmax.f32 %v1134_v27, 0.0 }
 0x258   :  { %v1491_v33 = vpack.c.bf16 %v1165_v29, %v1165_v29  ;;  %v1166_v34 = vmax.f32 %v1126_v30, 0.0 }
 0x259   :  { %1328 = vst.msk [vmem:[%s2329_s5 + $0x78] sm:$0xf] %vm1297_vm2, %v1493_v31  ;;  %v1494_v36 = vpack.c.bf16 %v1168_v32, %v1168_v32 }
 0x25a   :  { %1326 = vst.msk [vmem:[%s2329_s5 + $0x70] sm:$0xf] %vm1297_vm2, %v1491_v33  ;;  %v1492_v37 = vpack.c.bf16 %v1166_v34, %v1166_v34 }
 0x25b   :  { %1329 = vst.msk [vmem:[%s2329_s5 + $0x7c] sm:$0xf] %vm1297_vm2, %v1494_v36 }
 0x25c   :  { %1327 = vst.msk [vmem:[%s2329_s5 + $0x74] sm:$0xf] %vm1297_vm2, %v1492_v37 }
 0x25d   :  { %1764 = dma.done.wait [#allocation4], 64  }
 0x25e   :  { %1765 = vsyncadd [#allocation4], 4294967232 }
 0x25f   :  { %1347 = vsyncpa [#allocation4], 1 }

</bundles_post_ra>
